<compile_context>
chip_gen: v5e
topology: v5e:2x2
jax: 0.10.0
libtpu: 0.0.40
codegen_flags: <defaults>
</compile_context>

<pallas_src>
import functools
import math

import jax
import jax.numpy as jnp
from jax.experimental import pallas as pl
from jax.experimental.pallas import tpu as pltpu


def _recip(x):
    """1/x via EUP approximate reciprocal + one Newton-Raphson refinement.

    Keeps the exact divide off the VALU (free EUP slot in a memory-bound
    kernel) while staying well within 1e-5 of the exact result.
    """
    r = pl.reciprocal(x, approx=True)
    return r * (2.0 - x * r)


def _ln_kernel(x_ref, alpha_ref, bias_ref, o_ref, *, eps, features, prologue):
    """Standard path: one token per row, full feature dim on the lane axis."""
    x = x_ref[...].astype(jnp.float32)
    if prologue is not None:
        x = prologue(x)
    mean = jnp.mean(x, axis=-1, keepdims=True)
    c = x - mean
    # torch.Tensor.std uses Bessel's correction (N-1). features==1 -> NaN,
    # which matches torch's behavior.
    var = jnp.sum(c * c, axis=-1, keepdims=True) / float(features - 1)
    inv = _recip(jnp.sqrt(var) + eps)
    y = (c * inv) * alpha_ref[...].astype(jnp.float32) + bias_ref[...].astype(jnp.float32)
    o_ref[...] = y.astype(o_ref.dtype)


def _ln_folded_kernel(x_ref, alpha_ref, bias_ref, seg_ref, segT_ref, o_ref, *,
                      eps, features, prologue):
    """Lane-dense path for d < 128: k = 128/d tokens folded per row.

    Per-token reductions are segmented sums along the lane axis, done with
    tiny one-hot matmuls (seg: (k*d, k), segT: (k, k*d)) on the idle MXU.
    """
    x = x_ref[...].astype(jnp.float32)            # (tm, k*d)
    if prologue is not None:
        x = prologue(x)                            # must be elementwise
    seg = seg_ref[...]                             # (k*d, k) one-hot
    segT = segT_ref[...]                           # (k, k*d)
    sums = jnp.dot(x, seg, preferred_element_type=jnp.float32)          # (tm, k)
    mean = jnp.dot(sums / float(features), segT,
                   preferred_element_type=jnp.float32)                   # (tm, k*d)
    c = x - mean
    ssq = jnp.dot(c * c, seg, preferred_element_type=jnp.float32)       # (tm, k)
    inv_seg = _recip(jnp.sqrt(ssq / float(features - 1)) + eps)          # (tm, k)
    inv = jnp.dot(inv_seg, segT, preferred_element_type=jnp.float32)    # (tm, k*d)
    y = (c * inv) * alpha_ref[...].astype(jnp.float32) + bias_ref[...].astype(jnp.float32)
    o_ref[...] = y.astype(o_ref.dtype)


def _sublane_multiple(dtype):
    # 8 rows/vreg-sublane-group for 4-byte, 16 for 2-byte, 32 for 1-byte dtypes.
    return max(8, 32 // jnp.dtype(dtype).itemsize)


def _round_up(a, b):
    return (a + b - 1) // b * b


def _vmem_capacity_bytes():
    try:
        return int(pltpu.get_tpu_info().vmem_capacity_bytes)
    except Exception:
        # Conservative fallback (v7x per-TC VMEM).
        return 64 * 1024 * 1024


def layer_norm(x, alpha, bias, eps=1e-6, prologue=None):
    """LayerNormalization.forward over the last axis of x (any leading dims).

    `prologue`, if given, is an *elementwise* f32 function traced inside the
    kernel before normalization (used to fuse simple preceding layers).
    """
    *lead, d = x.shape
    n = math.prod(lead) if lead else 1
    orig_dtype = x.dtype
    itemsize = jnp.dtype(orig_dtype).itemsize
    sub = _sublane_multiple(orig_dtype)

    # Lane-dense folding for narrow feature dims: pack k = 128/d tokens per
    # kernel row so the last (lane) dim is a full 128 and stores are unmasked.
    fold = (d > 1) and (d < 128) and (128 % d == 0) and (n % (128 // d) == 0)
    if fold:
        k = 128 // d
        n_rows, d_eff = n // k, k * d
        x2 = x.reshape(n_rows, d_eff)
        a2 = jnp.tile(alpha.reshape(1, d).astype(jnp.float32), (1, k))
        b2 = jnp.tile(bias.reshape(1, d).astype(jnp.float32), (1, k))
        seg = jnp.repeat(jnp.eye(k, dtype=jnp.float32), d, axis=0)   # (k*d, k)
        segT = seg.T                                                  # (k, k*d)
    else:
        k = 1
        n_rows, d_eff = n, d
        x2 = x.reshape(n_rows, d_eff)
        a2 = alpha.reshape(1, d).astype(jnp.float32)
        b2 = bias.reshape(1, d).astype(jnp.float32)

    # --- VMEM-aware row-block selection -------------------------------------
    vmem_cap = _vmem_capacity_bytes()
    budget = min(vmem_cap // 2, 48 * 1024 * 1024)       # per-step working set
    per_row = 4 * d_eff * itemsize                       # 2 in + 2 out buffers
    tm_max = max(sub, (budget // max(per_row, 1)) // sub * sub)
    tm = min(512, tm_max)                                # 512 rows ~ HBM roofline
    tm = max(tm, sub)
    if tm >= n_rows:
        tm = n_rows                                      # single full-extent block
    grid = (pl.cdiv(n_rows, tm),)

    est = 4 * tm * d_eff * itemsize + 8 * d_eff * 4 + 2 * d_eff * k * 4
    vmem_limit = int(min(vmem_cap * 9 // 10,
                         max(2 * est, 32 * 1024 * 1024)))

    cparams = pltpu.CompilerParams(
        # Independent token blocks -> shard across TensorCores where present.
        dimension_semantics=("parallel",),
        vmem_limit_bytes=vmem_limit,
    )

    if fold:
        kernel = functools.partial(_ln_folded_kernel, eps=float(eps),
                                   features=d, prologue=prologue)
        out = pl.pallas_call(
            kernel,
            out_shape=jax.ShapeDtypeStruct((n_rows, d_eff), orig_dtype),
            grid=grid,
            in_specs=[
                pl.BlockSpec((tm, d_eff), lambda i: (i, 0)),
                pl.BlockSpec((1, d_eff), lambda i: (0, 0)),
                pl.BlockSpec((1, d_eff), lambda i: (0, 0)),
                pl.BlockSpec((d_eff, k), lambda i: (0, 0)),
                pl.BlockSpec((k, d_eff), lambda i: (0, 0)),
            ],
            out_specs=pl.BlockSpec((tm, d_eff), lambda i: (i, 0)),
            compiler_params=cparams,
        )(x2, a2, b2, seg, segT)
    else:
        kernel = functools.partial(_ln_kernel, eps=float(eps),
                                   features=d, prologue=prologue)
        out = pl.pallas_call(
            kernel,
            out_shape=jax.ShapeDtypeStruct((n_rows, d_eff), orig_dtype),
            grid=grid,
            in_specs=[
                pl.BlockSpec((tm, d_eff), lambda i: (i, 0)),
                pl.BlockSpec((1, d_eff), lambda i: (0, 0)),
                pl.BlockSpec((1, d_eff), lambda i: (0, 0)),
            ],
            out_specs=pl.BlockSpec((tm, d_eff), lambda i: (i, 0)),
            compiler_params=cparams,
        )(x2, a2, b2)

    return out.reshape(*lead, d)


def encoder_forward(x, mask, layers, alpha, bias, eps=1e-6):
    """Encoder.forward: apply each layer, then the Pallas LayerNormalization."""
    # TODO(synk): the nn.ModuleList layers are arbitrary user sub-modules not
    # defined in the spec; they are applied as opaque JAX callables here. When
    # the last layer is elementwise, pass it as `prologue=` to layer_norm to
    # fuse it into the LN kernel and save an HBM round-trip (done in the demo).
    for layer in layers:
        x = layer(x, mask)
    return layer_norm(x, alpha, bias, eps=eps)


if __name__ == "__main__":
    # Small deterministic shapes consistent with the module.
    B, S, features = 2, 8, 32
    eps = 1e-6

    key = jax.random.PRNGKey(0)
    k_x, k_a, k_b = jax.random.split(key, 3)

    x = jax.random.normal(k_x, (B, S, features), dtype=jnp.float32)
    mask = jnp.ones((B, 1, S, S), dtype=jnp.float32)  # consumed only by layers

    alpha = 1.0 + 0.1 * jax.random.normal(k_a, (features,), dtype=jnp.float32)
    bias = 0.1 * jax.random.normal(k_b, (features,), dtype=jnp.float32)

    # Simple deterministic "encoder layers" (stand-ins for the unspecified
    # nn.ModuleList contents).
    layers = [
        lambda h, m: h + 0.5 * jnp.tanh(h),
        lambda h, m: 0.9 * h + 0.05,
    ]

    # (1) General path: opaque layers outside, Pallas LayerNorm kernel.
    out = encoder_forward(x, mask, layers, alpha, bias, eps=eps)
    out = jax.block_until_ready(out)

    # (2) Fused path: these stand-in layers are elementwise and mask-free, so
    # fold them into the LN kernel as an in-kernel prologue.
    fused_prologue = lambda h: 0.9 * (h + 0.5 * jnp.tanh(h)) + 0.05
    out_fused = layer_norm(x, alpha, bias, eps=eps, prologue=fused_prologue)
    out_fused = jax.block_until_ready(out_fused)

    # Pure-JAX reference with identical torch semantics (unbiased std).
    h = x
    for layer in layers:
        h = layer(h, mask)
    mean = jnp.mean(h, axis=-1, keepdims=True)
    std = jnp.std(h, axis=-1, keepdims=True, ddof=1)
    ref = alpha * (h - mean) / (std + eps) + bias

    assert out.shape == (B, S, features)
    assert out.dtype == jnp.float32
    assert jnp.allclose(out, ref, atol=1e-5, rtol=1e-5)
    assert jnp.allclose(out_fused, ref, atol=1e-5, rtol=1e-5)

    # Also exercise the standard (wide-feature) path once.
    d2 = 256
    x2 = jax.random.normal(jax.random.PRNGKey(1), (4, 8, d2), dtype=jnp.float32)
    a2 = 1.0 + 0.05 * jax.random.normal(jax.random.PRNGKey(2), (d2,), jnp.float32)
    b2 = 0.02 * jax.random.normal(jax.random.PRNGKey(3), (d2,), jnp.float32)
    o2 = jax.block_until_ready(layer_norm(x2, a2, b2, eps=eps))
    m2 = jnp.mean(x2, axis=-1, keepdims=True)
    s2 = jnp.std(x2, axis=-1, keepdims=True, ddof=1)
    r2 = a2 * (x2 - m2) / (s2 + eps) + b2
    assert jnp.allclose(o2, r2, atol=1e-5, rtol=1e-5)

    print("KERNEL_OK")
</pallas_src>

<mosaic_0001>
module attributes {stable_mosaic.version = 11 : i64} {
  func.func @_ln_folded_kernel(%arg0: i32, %arg1: memref<4x128xf32, #tpu.memory_space<vmem>>, %arg2: memref<1x128xf32, #tpu.memory_space<vmem>>, %arg3: memref<1x128xf32, #tpu.memory_space<vmem>>, %arg4: memref<128x4xf32, #tpu.memory_space<vmem>>, %arg5: memref<4x128xf32, #tpu.memory_space<vmem>>, %arg6: memref<4x128xf32, #tpu.memory_space<vmem>>) attributes {dimension_semantics = [#tpu.dimension_semantics<parallel>], iteration_bounds = array<i64: 1>, scalar_prefetch = 0 : i64, scratch_operands = 0 : i64, tpu.core_type = #tpu.core_type<tc>, window_params = [{transform_indices = @transform_0, window_bounds = array<i64: 4, 128>}, {pipeline_mode = #tpu.pipeline_mode<synchronous>, transform_indices = @transform_1, window_bounds = array<i64: 1, 128>}, {pipeline_mode = #tpu.pipeline_mode<synchronous>, transform_indices = @transform_2, window_bounds = array<i64: 1, 128>}, {pipeline_mode = #tpu.pipeline_mode<synchronous>, transform_indices = @transform_3, window_bounds = array<i64: 128, 4>}, {pipeline_mode = #tpu.pipeline_mode<synchronous>, transform_indices = @transform_4, window_bounds = array<i64: 4, 128>}, {transform_indices = @transform_5, window_bounds = array<i64: 4, 128>}]} {
    %c0 = arith.constant 0 : index
    %c0_0 = arith.constant 0 : index
    %0 = vector.load %arg1[%c0, %c0_0] : memref<4x128xf32, #tpu.memory_space<vmem>>, vector<4x128xf32>
    %c0_1 = arith.constant 0 : index
    %c0_2 = arith.constant 0 : index
    %1 = vector.load %arg4[%c0_1, %c0_2] : memref<128x4xf32, #tpu.memory_space<vmem>>, vector<128x4xf32>
    %c0_3 = arith.constant 0 : index
    %c0_4 = arith.constant 0 : index
    %2 = vector.load %arg5[%c0_3, %c0_4] : memref<4x128xf32, #tpu.memory_space<vmem>>, vector<4x128xf32>
    %cst = arith.constant dense<0.000000e+00> : vector<4x4xf32>
    %3 = tpu.matmul %0, %1, %cst {dimension_numbers = #tpu.dot_dimension_numbers<[1], [0], [0], [1], [0, 0, 1, 1], [], []>} : vector<4x128xf32>, vector<128x4xf32>, vector<4x4xf32> -> vector<4x4xf32>
    %cst_5 = arith.constant 3.200000e+01 : f32
    %4 = vector.broadcast %cst_5 : f32 to vector<4x4xf32>
    %5 = arith.divf %3, %4 : vector<4x4xf32>
    %cst_6 = arith.constant dense<0.000000e+00> : vector<4x128xf32>
    %6 = tpu.matmul %5, %2, %cst_6 {dimension_numbers = #tpu.dot_dimension_numbers<[1], [0], [0], [1], [0, 0, 1, 1], [], []>} : vector<4x4xf32>, vector<4x128xf32>, vector<4x128xf32> -> vector<4x128xf32>
    %7 = arith.subf %0, %6 : vector<4x128xf32>
    %8 = arith.mulf %7, %7 : vector<4x128xf32>
    %cst_7 = arith.constant dense<0.000000e+00> : vector<4x4xf32>
    %9 = tpu.matmul %8, %1, %cst_7 {dimension_numbers = #tpu.dot_dimension_numbers<[1], [0], [0], [1], [0, 0, 1, 1], [], []>} : vector<4x128xf32>, vector<128x4xf32>, vector<4x4xf32> -> vector<4x4xf32>
    %cst_8 = arith.constant 3.100000e+01 : f32
    %10 = vector.broadcast %cst_8 : f32 to vector<4x4xf32>
    %11 = arith.divf %9, %10 : vector<4x4xf32>
    %12 = math.sqrt %11 : vector<4x4xf32>
    %cst_9 = arith.constant 9.99999997E-7 : f32
    %13 = vector.broadcast %cst_9 : f32 to vector<4x4xf32>
    %14 = arith.addf %12, %13 : vector<4x4xf32>
    %15 = tpu.reciprocal %14 {approx = true} : vector<4x4xf32> -> vector<4x4xf32>
    %16 = arith.mulf %14, %15 : vector<4x4xf32>
    %cst_10 = arith.constant 2.000000e+00 : f32
    %17 = vector.broadcast %cst_10 : f32 to vector<4x4xf32>
    %18 = arith.subf %17, %16 : vector<4x4xf32>
    %19 = arith.mulf %15, %18 : vector<4x4xf32>
    %cst_11 = arith.constant dense<0.000000e+00> : vector<4x128xf32>
    %20 = tpu.matmul %19, %2, %cst_11 {dimension_numbers = #tpu.dot_dimension_numbers<[1], [0], [0], [1], [0, 0, 1, 1], [], []>} : vector<4x4xf32>, vector<4x128xf32>, vector<4x128xf32> -> vector<4x128xf32>
    %21 = arith.mulf %7, %20 : vector<4x128xf32>
    %c0_12 = arith.constant 0 : index
    %c0_13 = arith.constant 0 : index
    %22 = vector.load %arg2[%c0_12, %c0_13] : memref<1x128xf32, #tpu.memory_space<vmem>>, vector<1x128xf32>
    %23 = vector.broadcast %22 : vector<1x128xf32> to vector<4x128xf32>
    %24 = arith.mulf %21, %23 : vector<4x128xf32>
    %c0_14 = arith.constant 0 : index
    %c0_15 = arith.constant 0 : index
    %25 = vector.load %arg3[%c0_14, %c0_15] : memref<1x128xf32, #tpu.memory_space<vmem>>, vector<1x128xf32>
    %26 = vector.broadcast %25 : vector<1x128xf32> to vector<4x128xf32>
    %27 = arith.addf %24, %26 : vector<4x128xf32>
    %c0_16 = arith.constant 0 : index
    %c0_17 = arith.constant 0 : index
    %28 = vector.load %arg6[%c0_16, %c0_17] : memref<4x128xf32, #tpu.memory_space<vmem>>, vector<4x128xf32>
    tpu.vector_store %arg6[%c0_16, %c0_17], %27 {strides = array<i32>} : memref<4x128xf32, #tpu.memory_space<vmem>>, vector<4x128xf32>,
    return
  }
  func.func @transform_0(%arg0: i32) -> (i32, i32) {
    %c0_i32 = arith.constant 0 : i32
    %c0_i32_0 = arith.constant 0 : i32
    return %arg0, %c0_i32 : i32, i32
  }
  func.func @transform_1(%arg0: i32) -> (i32, i32) {
    %c0_i32 = arith.constant 0 : i32
    %c0_i32_0 = arith.constant 0 : i32
    %c0_i32_1 = arith.constant 0 : i32
    return %c0_i32, %c0_i32_0 : i32, i32
  }
  func.func @transform_2(%arg0: i32) -> (i32, i32) {
    %c0_i32 = arith.constant 0 : i32
    %c0_i32_0 = arith.constant 0 : i32
    %c0_i32_1 = arith.constant 0 : i32
    return %c0_i32, %c0_i32_0 : i32, i32
  }
  func.func @transform_3(%arg0: i32) -> (i32, i32) {
    %c0_i32 = arith.constant 0 : i32
    %c0_i32_0 = arith.constant 0 : i32
    %c0_i32_1 = arith.constant 0 : i32
    return %c0_i32, %c0_i32_0 : i32, i32
  }
  func.func @transform_4(%arg0: i32) -> (i32, i32) {
    %c0_i32 = arith.constant 0 : i32
    %c0_i32_0 = arith.constant 0 : i32
    %c0_i32_1 = arith.constant 0 : i32
    return %c0_i32, %c0_i32_0 : i32, i32
  }
  func.func @transform_5(%arg0: i32) -> (i32, i32) {
    %c0_i32 = arith.constant 0 : i32
    %c0_i32_0 = arith.constant 0 : i32
    return %arg0, %c0_i32 : i32, i32
  }
}

</mosaic_0001>

<bundles_post_ra>
// kernel: tpu_custom_call.1
= control target key start
LH: loop header
LB: loop body
LE: loop exit
PB: predicated region body
PF: predicated region fallthrough
CT: control target
= control target key end

     0   :  { %s334_s0 = inlined_call_operand.vmem [shape: f32[4,128], index: 0, kind: input, shape index: {}]   ;;  %s335_s1 = inlined_call_operand.vmem [shape: f32[1,128], index: 1, kind: input, shape index: {}]   ;;  %s336_s2 = inlined_call_operand.vmem [shape: f32[1,128], index: 2, kind: input, shape index: {}]   ;;  %s337_s3 = inlined_call_operand.vmem [shape: f32[128,4], index: 3, kind: input, shape index: {}]   ;;  %s338_s4 = inlined_call_operand.vmem [shape: f32[4,128], index: 4, kind: input, shape index: {}]   ;;  %s339_s5 = inlined_call_operand.hbm [shape: f32[4,128], index: 5, kind: output, shape index: {}]  }
   0x1   :  { %v37_v0 = vld [vmem:[%s337_s3 + $0x78] sm:$0xff]  ;;  %v36_v1 = vld [vmem:[%s337_s3 + $0x70] sm:$0xff]  ;;  %v35_v2 = vld [vmem:[%s337_s3 + $0x68] sm:$0xff] }
   0x2   :  { %39 = vmatpush.msra.mxu0 %v37_v0  ;;  %97 = vmatpush.msra.mxu2 %v37_v0  ;;  %v34_v3 = vld [vmem:[%s337_s3 + $0x60] sm:$0xff]  ;;  %v33_v4 = vld [vmem:[%s337_s3 + $0x58] sm:$0xff] }
   0x4   :  { %40 = vmatpush.msra.mxu0 %v36_v1  ;;  %98 = vmatpush.msra.mxu2 %v36_v1 }
   0x6   :  { %41 = vmatpush.msra.mxu0 %v35_v2  ;;  %99 = vmatpush.msra.mxu2 %v35_v2 }
   0x7   :  { %10 = vsyncpa [#allocation3], 0  ;;  %v32_v5 = vld [vmem:[%s337_s3 + $0x50] sm:$0xff]  ;;  %v31_v6 = vld [vmem:[%s337_s3 + $0x48] sm:$0xff]  ;;  %vm71_vm0 = vcmask 1043456   ;;  %v236_v18 = vmov 32.0  }
   0x8   :  { %42 = vmatpush.msra.mxu0 %v34_v3  ;;  %100 = vmatpush.msra.mxu2 %v34_v3  ;;  %v30_v7 = vld [vmem:[%s337_s3 + $0x40] sm:$0xff]  ;;  %v29_v8 = vld [vmem:[%s337_s3 + $0x38] sm:$0xff]  ;;  %v28_v9 = vld [vmem:[%s337_s3 + $0x30] sm:$0xff]  ;;  %202 = vrcp.f32 %v236_v18  ;;  %vm67_vm2 = vcmask 31744   ;;  %v237_v30 = vmov 31.0   ;;  %s238_s30 = smov [#allocation2]  }
   0x9   :  { %v27_v10 = vld [vmem:[%s337_s3 + $0x28] sm:$0xff]  ;;  %v26_v11 = vld [vmem:[%s337_s3 + $0x20] sm:$0xff]  ;;  %v25_v12 = vld [vmem:[%s337_s3 + $0x18] sm:$0xff]  ;;  %204 = vrcp.f32 %v237_v30  ;;  %s182_s6 = sshll.u32 %s238_s30, 4  ;;  %s184_s9 = sshll.u32 %s339_s5, 4  ;;  %s183_s6 = int_to_ptr.vmem [resolvable:$true] %s182_s6  ;;  %s185_s9 = int_to_ptr.hbm [resolvable:$true] %s184_s9 }
   0xa   :  { %43 = vmatpush.msra.mxu0 %v33_v4  ;;  %101 = vmatpush.msra.mxu2 %v33_v4  ;;  %v24_v13 = vld [vmem:[%s337_s3 + $0x10] sm:$0xff]  ;;  %v23_v14 = vld [vmem:[%s337_s3 + $0x8] sm:$0xff]  ;;  %v22_v15 = vld [vmem:[%s337_s3] sm:$0xff] }
   0xb   :  { %v21_v16 = vld [vmem:[%s334_s0] sm:$0xf] }
   0xc   :  { %44 = vmatpush.msra.mxu0 %v32_v5  ;;  %102 = vmatpush.msra.mxu2 %v32_v5  ;;  %v38_v17 = vld [vmem:[%s338_s4] sm:$0xf] }
   0xd   :  { %193 = vmatpush.msk.msra.mxu1 %vm71_vm0, %v38_v17  ;;  %195 = vmatpush.msk.msra.mxu3 %vm71_vm0, %v38_v17  ;;  %v200_v54 = vld [vmem:[%s335_s1] ss:$0 sm:$0xff] }
   0xe   :  { %45 = vmatpush.msra.mxu0 %v31_v6  ;;  %103 = vmatpush.msra.mxu2 %v31_v6  ;;  %v203_v19 = vpop.eup %202  ;;  %v201_v57 = vld [vmem:[%s336_s2] ss:$0 sm:$0xff] }
   0xf   :  { %v60_v20 = vmul.f32 32.0, %v203_v19  ;;  %vm64_vm1 = vweird.f32 %v203_v19  ;;  %v205_v31 = vpop.eup %204 }
  0x10   :  { %46 = vmatpush.msra.mxu0 %v30_v7  ;;  %104 = vmatpush.msra.mxu2 %v30_v7  ;;  %v118_v32 = vmul.f32 31.0, %v205_v31  ;;  %vm122_vm3 = vweird.f32 %v205_v31 }
  0x11   :  { %v61_v21 = vsub.f32 1.0, %v60_v20 }
  0x12   :  { %47 = vmatpush.msra.mxu0 %v29_v8  ;;  %105 = vmatpush.msra.mxu2 %v29_v8  ;;  %v119_v33 = vsub.f32 1.0, %v118_v32 }
  0x13   :  { %v62_v22 = vmul.f32 %v203_v19, %v61_v21 }
  0x14   :  { %48 = vmatpush.msra.mxu0 %v28_v9  ;;  %106 = vmatpush.msra.mxu2 %v28_v9  ;;  %v120_v34 = vmul.f32 %v205_v31, %v119_v33 }
  0x15   :  { %v63_v23 = vadd.f32 %v203_v19, %v62_v22 }
  0x16   :  { %49 = vmatpush.msra.mxu0 %v27_v10  ;;  %107 = vmatpush.msra.mxu2 %v27_v10  ;;  %v121_v35 = vadd.f32 %v205_v31, %v120_v34 }
  0x17   :  { %v65_v24 = vsel %vm64_vm1, %v203_v19, %v63_v23 }
  0x18   :  { %50 = vmatpush.msra.mxu0 %v26_v11  ;;  %108 = vmatpush.msra.mxu2 %v26_v11  ;;  %v123_v36 = vsel %vm122_vm3, %v205_v31, %v121_v35 }
  0x1a   :  { %51 = vmatpush.msra.mxu0 %v25_v12  ;;  %109 = vmatpush.msra.mxu2 %v25_v12 }
  0x1c   :  { %52 = vmatpush.msra.mxu0 %v24_v13  ;;  %110 = vmatpush.msra.mxu2 %v24_v13 }
  0x1e   :  { %53 = vmatpush.msra.mxu0 %v23_v14  ;;  %111 = vmatpush.msra.mxu2 %v23_v14 }
  0x20   :  { %54 = vmatpush.msra.mxu0 %v22_v15  ;;  %112 = vmatpush.msra.mxu2 %v22_v15 }
  0x21   :  { %55 = vmatmul.f32.vlgmr.msra.gmra.mxu0 %v21_v16 }
  0x9e   :  { %v56_v25 = vpop.f32.mrf.mxu0 }
  0x9f   :  { %v66_v26 = vmul.f32 %v65_v24, %v56_v25 }
  0xa1   :  { %194 = vmatmul.msk.f32.vlgmr.msra.gmra.mxu1 %vm67_vm2, %v66_v26 }
 0x11e   :  { %v92_v27 = vpop.f32.mrf.mxu1 }
 0x11f   :  { %v95_v28 = vsub.f32 %v21_v16, %v92_v27 }
 0x121   :  { %v96_v29 = vmul.f32 %v95_v28, %v95_v28 }
 0x123   :  { %113 = vmatmul.f32.vlgmr.msra.gmra.mxu2 %v96_v29 }
 0x1a6   :  { %v114_v37 = vpop.f32.mrf.mxu2 }
 0x1a7   :  { %v124_v38 = vmul.f32 %v123_v36, %v114_v37 }
 0x1a9   :  { %206 = vrsqrt.f32 %v124_v38  ;;  %vm132_vm4 = vcmp.eq.f32.partialorder %v124_v38, inf  ;;  %v135_v46 = vand.u32 2147483648, %v124_v38  ;;  %vm134_vm5 = vcmp.eq.f32.partialorder %v124_v38, 0.0 }
 0x1af   :  { %v207_v39 = vpop.eup %206 }
 0x1b0   :  { %v126_v40 = vmul.f32 %v207_v39, %v124_v38 }
 0x1b2   :  { %v127_v41 = vmul.f32 %v207_v39, %v126_v40 }
 0x1b4   :  { %v128_v42 = vmul.f32 0.5, %v127_v41 }
 0x1b6   :  { %v129_v43 = vsub.f32 1.5, %v128_v42 }
 0x1b8   :  { %v130_v44 = vmul.f32 %v207_v39, %v129_v43 }
 0x1ba   :  { %v131_v45 = vmul.f32 %v130_v44, %v124_v38 }
 0x1bc   :  { %v133_v47 = vsel %vm132_vm4, %v124_v38, %v131_v45 }
 0x1bd   :  { %v136_v48 = vsel %vm134_vm5, %v135_v46, %v133_v47 }
 0x1be   :  { %v137_v49 = vadd.f32 1e-06, %v136_v48 }
 0x1c0   :  { %208 = vrcp.f32 %v137_v49 }
 0x1c6   :  { %v209_v50 = vpop.eup %208 }
 0x1c7   :  { %v139_v51 = vmul.f32 %v209_v50, %v137_v49 }
 0x1c9   :  { %v140_v52 = vsub.f32 2.0, %v139_v51 }
 0x1cb   :  { %v141_v53 = vmul.f32 %v209_v50, %v140_v52 }
 0x1cd   :  { %196 = vmatmul.msk.f32.vlgmr.msra.gmra.mxu3 %vm67_vm2, %v141_v53 }
 0x250   :  { %v162_v55 = vpop.f32.mrf.mxu3 }
 0x251   :  { %v165_v56 = vmul.f32 %v162_v55, %v95_v28 }
 0x253   :  { %v170_v58 = vmul.f32 %v200_v54, %v165_v56 }
 0x255   :  { %v175_v59 = vadd.f32 %v201_v57, %v170_v58 }
 0x257   :  { %176 = vst [vmem:[#allocation2] sm:$0xf] %v175_v59 }
 0x258   :  { %187 = dma.vmem_to_hbm [thread:$0]  %s183_s6, 64, %s185_s9, [#allocation3]  }
 0x259   :  { %234 = dma.done.wait [#allocation3], 64  }
 0x25a   :  { %235 = vsyncadd [#allocation3], 4294967232 }
 0x25b   :  { %192 = vsyncpa [#allocation3], 1 }

</bundles_post_ra>
